<compile_context>
chip_gen: v7x
topology: tpu7x:2x2x1
jax: 0.10.0
libtpu: 0.0.40
codegen_flags: <defaults>
</compile_context>

<pallas_src>
import functools

import jax
import jax.numpy as jnp
from jax.experimental import pallas as pl
from jax.experimental.pallas import tpu as pltpu


# ---------------------------------------------------------------------------
# BlockSpec helpers (grid is 1-D over the batch).
# ---------------------------------------------------------------------------
def _const_spec(shape):
    """Whole array resident, same block every grid step."""
    nd = len(shape)
    return pl.BlockSpec(tuple(shape), lambda b, _n=nd: (0,) * _n)


def _batch_spec(shape):
    """Block the leading (batch) dim; full extent on the remaining dims."""
    nd = len(shape)
    return pl.BlockSpec((1,) + tuple(shape[1:]),
                        lambda b, _n=nd: (b,) + (0,) * (_n - 1))


# ---------------------------------------------------------------------------
# Fused DownBlock kernel (per batch element, everything resident in VMEM).
# Activations are (T, V*C); all heavy work is 8 dense MXU matmuls.
# ---------------------------------------------------------------------------
def _downblock_kernel(x_ref, brow1_ref, w1_ref, w2_ref, b2row_ref,
                      g_ref, bln_ref, msp_ref, bsprow_ref, *rest,
                      outer_identity: bool):
    """Refs:
      x_ref    : (1, T, V*C_in)    input block, lane-flattened (t, v*C_in + i)
      brow1_ref: (1, 1, V*C_out)   per-batch: t-emb + conv1 bias + shortcut1 bias
      w1_ref   : (KW, V*C_in, V*C_out)  banded conv mats (1x1/identity shortcut
                                        folded into the dt = KW-1 slab)
      w2_ref   : (KW, V*C_out, V*C_out) same for tcn2 (identity folded in)
      b2row_ref: (1, V*C_out)      tcn2 conv bias, tiled over V
      g_ref    : (1, V*C_out)      LayerNorm gamma (V, C) flattened
      bln_ref  : (1, V*C_out)      LayerNorm beta
      msp_ref  : (V*C_out, V*C_out) sum_k kron(Lk^T, theta_k)
      bsprow_ref:(1, V*C_out)      spatial bias, tiled over V
      rest     : (wsc_ref, bscrow_ref, o_ref) or (o_ref,) when outer shortcut
                 is the identity.
    """
    if outer_identity:
        (o_ref,) = rest
        wsc_ref = bscrow_ref = None
    else:
        wsc_ref, bscrow_ref, o_ref = rest

    T = o_ref.shape[1]
    KW = w1_ref.shape[0]
    vc_out = o_ref.shape[2]

    x = x_ref[0].astype(jnp.float32)                         # (T, V*C_in)

    def causal_conv(inp, w_ref):
        # Left-only zero pad on time == fused Chomp; V taps + channel
        # contraction + shortcut live inside the banded weight matrices.
        vc = inp.shape[1]
        xp = jnp.concatenate(
            [jnp.zeros((KW - 1, vc), jnp.float32), inp], axis=0)  # (T+KW-1, vc)
        acc = jnp.zeros((T, vc_out), jnp.float32)
        for dt in range(KW):                                 # static unroll (KW=3)
            acc = acc + jnp.dot(xp[dt:dt + T, :], w_ref[dt],
                                preferred_element_type=jnp.float32)
        return acc

    # --- TcnBlock 1: conv + bias + t-embedding + 1x1/identity shortcut ------
    h = causal_conv(x, w1_ref) + brow1_ref[0].astype(jnp.float32)

    # --- TcnBlock 2: conv + bias + identity shortcut -------------------------
    h = causal_conv(h, w2_ref) + b2row_ref[...].astype(jnp.float32)

    # --- LayerNorm over (V, C) == one 128-lane row per time step -------------
    mu = jnp.mean(h, axis=-1, keepdims=True)
    d = h - mu
    var = jnp.mean(d * d, axis=-1, keepdims=True)
    hn = d * jax.lax.rsqrt(var + 1e-5) * g_ref[...].astype(jnp.float32) \
         + bln_ref[...].astype(jnp.float32)

    # --- SpatialBlock: relu(sum_k theta_k (Lk hn) + b + hn) -------------------
    sp = jnp.dot(hn, msp_ref[...], preferred_element_type=jnp.float32)
    sp = jnp.maximum(sp + bsprow_ref[...].astype(jnp.float32) + hn, 0.0)

    # --- outer residual shortcut (1x1 conv, skipped if identity) -------------
    if outer_identity:
        skip = x
    else:
        skip = (jnp.dot(x, wsc_ref[...], preferred_element_type=jnp.float32)
                + bscrow_ref[...].astype(jnp.float32))

    o_ref[0] = (sp + skip).astype(o_ref.dtype)               # lane-dense store


# ---------------------------------------------------------------------------
# Wrapper-side weight refactoring (tiny XLA ops, no HBM activation passes).
# ---------------------------------------------------------------------------
def _banded_conv_weight(w_oihw, V):
    """(C_out, C_in, KH, KW) conv weight -> (KW, V*C_in, V*C_out) banded mats.

    For a fixed time tap dt the V-axis taps + channel contraction become one
    dense matmul:  h_dt[t, v*C_out + o] = sum_{m,i} x[t+dt-(KW-1), m*C_in+i]
                                           * M[dt][m*C_in+i, v*C_out+o],
    with M[dt] = sum_kh kron(S_kh, W[:, :, kh, dt].T),  S_kh[m, v] = [m == v+kh-1].
    """
    c_out, c_in, KH, KW = w_oihw.shape
    mats = []
    for dt in range(KW):
        m = jnp.zeros((V * c_in, V * c_out), w_oihw.dtype)
        for kh in range(KH):
            shift = jnp.eye(V, k=1 - kh, dtype=w_oihw.dtype)
            m = m + jnp.kron(shift, w_oihw[:, :, kh, dt].T)
        mats.append(m)
    return jnp.stack(mats, axis=0)


def _tile_rows(vec, V):
    """vec[..., C] -> vec_row[..., V*C] with value[v*C + c] = vec[..., c]."""
    return jnp.tile(vec, (V,)) if vec.ndim == 1 else jnp.tile(vec, (1, V))


# ---------------------------------------------------------------------------
# DownBlock forward (NCHW in / NCHW out; lane-dense (B, T, V*C) internally).
# ---------------------------------------------------------------------------
def downblock_forward(x, t, supports, params):
    """x: (B, c_in, V, T), t: (B, d_h), supports: (Ks, V, V) -> (B, c_out, V, T)."""
    if supports.ndim == 2:
        supports = supports[None]
    B, C_in, V, T = x.shape
    C_out, _, _, KW = params["w1"].shape
    Ks = supports.shape[0]
    vc_in, vc_out = V * C_in, V * C_out
    same_ch = (C_in == C_out)
    f32 = jnp.float32

    # lane-dense activation layout: (B, T, V*C_in)
    x2 = jnp.transpose(x, (0, 3, 2, 1)).reshape(B, T, vc_in)

    # --- tcn1 banded weights; 1x1 / identity shortcut folded into dt=KW-1 ----
    w1 = _banded_conv_weight(params["w1"].astype(f32), V)
    if same_ch:
        w1 = w1.at[KW - 1].add(jnp.eye(vc_in, dtype=f32))
        sc1_bias = jnp.zeros((C_out,), f32)
    else:
        w1 = w1.at[KW - 1].add(
            jnp.kron(jnp.eye(V, dtype=f32), params["w1_sc"].T.astype(f32)))
        sc1_bias = params["b1_sc"].astype(f32)

    # t-embedding: plain dense matmul (no separate pallas launch), fused with
    # all tcn1 bias terms into one per-batch row vector.
    temb = t.astype(f32) @ params["wt"].T.astype(f32) + params["bt"].astype(f32)
    brow1 = _tile_rows(temb + params["b1"].astype(f32) + sc1_bias, V)
    brow1 = brow1.reshape(B, 1, vc_out)

    # --- tcn2 banded weights; identity shortcut folded into dt=KW-1 ----------
    w2 = _banded_conv_weight(params["w2"].astype(f32), V)
    w2 = w2.at[KW - 1].add(jnp.eye(vc_out, dtype=f32))
    b2row = _tile_rows(params["b2"].astype(f32), V).reshape(1, vc_out)

    # --- LayerNorm affine rows ------------------------------------------------
    g_row = params["ln_g"].astype(f32).reshape(1, vc_out)
    bln_row = params["ln_b"].astype(f32).reshape(1, vc_out)

    # --- SpatialBlock collapsed to a single (V*C, V*C) matrix ------------------
    msp = jnp.zeros((vc_out, vc_out), f32)
    for k in range(Ks):
        msp = msp + jnp.kron(supports[k].T.astype(f32),
                             params["theta"][:, :, k].astype(f32))
    bsp_row = _tile_rows(params["b_sp"].astype(f32), V).reshape(1, vc_out)

    # --- outer residual shortcut -----------------------------------------------
    if same_ch:
        extra_in, extra_specs = [], []
    else:
        wsc = jnp.kron(jnp.eye(V, dtype=f32), params["w_sc"].T.astype(f32))
        bsc_row = _tile_rows(params["b_sc"].astype(f32), V).reshape(1, vc_out)
        extra_in = [wsc, bsc_row]
        extra_specs = [_const_spec(wsc.shape), _const_spec(bsc_row.shape)]

    # --- cost hint --------------------------------------------------------------
    mm_flops = 2 * T * (KW * vc_in * vc_out + KW * vc_out * vc_out
                        + vc_out * vc_out)
    if not same_ch:
        mm_flops += 2 * T * vc_in * vc_out
    flops = B * (mm_flops + 12 * T * vc_out)
    bytes_acc = 4 * (B * T * vc_in + B * T * vc_out + B * vc_out
                     + KW * vc_in * vc_out + KW * vc_out * vc_out
                     + vc_out * vc_out + 6 * vc_out
                     + (0 if same_ch else vc_in * vc_out))

    out2 = pl.pallas_call(
        functools.partial(_downblock_kernel, outer_identity=same_ch),
        out_shape=jax.ShapeDtypeStruct((B, T, vc_out), x.dtype),
        grid=(B,),
        in_specs=[_batch_spec((B, T, vc_in)),
                  _batch_spec((B, 1, vc_out)),
                  _const_spec(w1.shape),
                  _const_spec(w2.shape),
                  _const_spec(b2row.shape),
                  _const_spec(g_row.shape),
                  _const_spec(bln_row.shape),
                  _const_spec(msp.shape),
                  _const_spec(bsp_row.shape)] + extra_specs,
        out_specs=_batch_spec((B, T, vc_out)),
        compiler_params=pltpu.CompilerParams(
            dimension_semantics=("parallel",)),
        cost_estimate=pl.CostEstimate(flops=int(flops), transcendentals=int(B * T),
                                      bytes_accessed=int(bytes_acc)),
    )(x2, brow1, w1, w2, b2row, g_row, bln_row, msp, bsp_row, *extra_in)

    return jnp.transpose(out2.reshape(B, T, V, C_out), (0, 3, 2, 1))


# ---------------------------------------------------------------------------
# Pure-JAX reference (mirrors the PyTorch module, eval-mode dropout).
# ---------------------------------------------------------------------------
def downblock_reference(x, t, Lk, p):
    if Lk.ndim == 2:
        Lk = Lk[None]
    C_in = x.shape[1]
    C_out = p["w1"].shape[0]

    def conv1x1(inp, w, b):
        return jnp.einsum("oi,bivt->bovt", w, inp) + b[None, :, None, None]

    def tcn(inp, W, b, w_sc, b_sc):
        K = W.shape[-1]
        y = jax.lax.conv_general_dilated(
            inp, W, window_strides=(1, 1),
            padding=((1, 1), (K - 1, K - 1)),
            dimension_numbers=("NCHW", "OIHW", "NCHW"))
        y = y + b[None, :, None, None]
        y = y[:, :, :, : inp.shape[-1]]                  # Chomp(K-1)
        skip = inp if w_sc is None else conv1x1(inp, w_sc, b_sc)
        return y + skip

    h = tcn(x, p["w1"], p["b1"],
            None if C_in == C_out else p["w1_sc"],
            None if C_in == C_out else p["b1_sc"])
    h = h + (t @ p["wt"].T + p["bt"])[:, :, None, None]
    h = tcn(h, p["w2"], p["b2"], None, None)

    ht = jnp.transpose(h, (0, 3, 2, 1))                  # (B, T, V, C)
    mu = jnp.mean(ht, axis=(2, 3), keepdims=True)
    var = jnp.mean((ht - mu) ** 2, axis=(2, 3), keepdims=True)
    ht = (ht - mu) / jnp.sqrt(var + 1e-5) * p["ln_g"] + p["ln_b"]
    h = jnp.transpose(ht, (0, 3, 2, 1))

    xs = jnp.transpose(h, (0, 1, 3, 2))                  # (B, C, T, V)
    x_c = jnp.einsum("knm,bitm->bitkn", Lk, xs)
    x_gc = jnp.einsum("iok,bitkn->botn", p["theta"], x_c) \
        + p["b_sp"][None, :, None, None]
    h = jnp.transpose(jax.nn.relu(x_gc + xs), (0, 1, 3, 2))

    skip = x if C_in == C_out else conv1x1(x, p["w_sc"], p["b_sc"])
    return h + skip


# ---------------------------------------------------------------------------
if __name__ == "__main__":
    key = jax.random.PRNGKey(0)
    keys = jax.random.split(key, 16)

    B, C_in, C_out = 2, 4, 8
    V, T = 16, 16                    # graph nodes, time steps  (V * C_out = 128)
    d_h, supports_len, K = 32, 2, 3
    s = 0.2

    x = jax.random.normal(keys[0], (B, C_in, V, T), jnp.float32)
    t = jax.random.normal(keys[1], (B, d_h), jnp.float32)
    supports = s * jax.random.normal(keys[2], (supports_len, V, V), jnp.float32)

    params = {
        "w1":    s * jax.random.normal(keys[3], (C_out, C_in, 3, K), jnp.float32),
        "b1":    s * jax.random.normal(keys[4], (C_out,), jnp.float32),
        "w1_sc": s * jax.random.normal(keys[5], (C_out, C_in), jnp.float32),
        "b1_sc": s * jax.random.normal(keys[6], (C_out,), jnp.float32),
        "w2":    s * jax.random.normal(keys[7], (C_out, C_out, 3, K), jnp.float32),
        "b2":    s * jax.random.normal(keys[8], (C_out,), jnp.float32),
        "wt":    s * jax.random.normal(keys[9], (C_out, d_h), jnp.float32),
        "bt":    s * jax.random.normal(keys[10], (C_out,), jnp.float32),
        "ln_g":  1.0 + 0.1 * jax.random.normal(keys[11], (V, C_out), jnp.float32),
        "ln_b":  0.1 * jax.random.normal(keys[12], (V, C_out), jnp.float32),
        "theta": s * jax.random.normal(keys[13], (C_out, C_out, supports_len), jnp.float32),
        "b_sp":  s * jax.random.normal(keys[14], (C_out,), jnp.float32),
        "w_sc":  s * jax.random.normal(keys[15], (C_out, C_in), jnp.float32),
        "b_sc":  jnp.zeros((C_out,), jnp.float32),
    }

    out = jax.jit(downblock_forward)(x, t, supports, params)
    jax.block_until_ready(out)

    ref = downblock_reference(x, t, supports, params)
    assert out.shape == (B, C_out, V, T), out.shape
    err = float(jnp.max(jnp.abs(out - ref)))
    assert err < 1e-3, f"max |pallas - reference| = {err}"

    print("KERNEL_OK")
</pallas_src>

<mosaic_0001>
module attributes {stable_mosaic.version = 11 : i64} {
  func.func @_downblock_kernel(%arg0: i32, %arg1: memref<1x16x64xf32, #tpu.memory_space<vmem>>, %arg2: memref<1x1x128xf32, #tpu.memory_space<vmem>>, %arg3: memref<3x64x128xf32, #tpu.memory_space<vmem>>, %arg4: memref<3x128x128xf32, #tpu.memory_space<vmem>>, %arg5: memref<1x128xf32, #tpu.memory_space<vmem>>, %arg6: memref<1x128xf32, #tpu.memory_space<vmem>>, %arg7: memref<1x128xf32, #tpu.memory_space<vmem>>, %arg8: memref<128x128xf32, #tpu.memory_space<vmem>>, %arg9: memref<1x128xf32, #tpu.memory_space<vmem>>, %arg10: memref<64x128xf32, #tpu.memory_space<vmem>>, %arg11: memref<1x128xf32, #tpu.memory_space<vmem>>, %arg12: memref<1x16x128xf32, #tpu.memory_space<vmem>>) attributes {dimension_semantics = [#tpu.dimension_semantics<parallel>], iteration_bounds = array<i64: 2>, scalar_prefetch = 0 : i64, scratch_operands = 0 : i64, tpu.core_type = #tpu.core_type<tc>, window_params = [{transform_indices = @transform_0, window_bounds = array<i64: 1, 16, 64>}, {transform_indices = @transform_1, window_bounds = array<i64: 1, 1, 128>}, {pipeline_mode = #tpu.pipeline_mode<synchronous>, transform_indices = @transform_2, window_bounds = array<i64: 3, 64, 128>}, {pipeline_mode = #tpu.pipeline_mode<synchronous>, transform_indices = @transform_3, window_bounds = array<i64: 3, 128, 128>}, {pipeline_mode = #tpu.pipeline_mode<synchronous>, transform_indices = @transform_4, window_bounds = array<i64: 1, 128>}, {pipeline_mode = #tpu.pipeline_mode<synchronous>, transform_indices = @transform_5, window_bounds = array<i64: 1, 128>}, {pipeline_mode = #tpu.pipeline_mode<synchronous>, transform_indices = @transform_6, window_bounds = array<i64: 1, 128>}, {pipeline_mode = #tpu.pipeline_mode<synchronous>, transform_indices = @transform_7, window_bounds = array<i64: 128, 128>}, {pipeline_mode = #tpu.pipeline_mode<synchronous>, transform_indices = @transform_8, window_bounds = array<i64: 1, 128>}, {pipeline_mode = #tpu.pipeline_mode<synchronous>, transform_indices = @transform_9, window_bounds = array<i64: 64, 128>}, {pipeline_mode = #tpu.pipeline_mode<synchronous>, transform_indices = @transform_10, window_bounds = array<i64: 1, 128>}, {transform_indices = @transform_11, window_bounds = array<i64: 1, 16, 128>}]} {
    %c0 = arith.constant 0 : index
    %c0_0 = arith.constant 0 : index
    %c0_1 = arith.constant 0 : index
    %0 = vector.load %arg1[%c0, %c0_0, %c0_1] : memref<1x16x64xf32, #tpu.memory_space<vmem>>, vector<1x16x64xf32>
    %1 = vector.shape_cast %0 : vector<1x16x64xf32> to vector<16x64xf32>
    %cst = arith.constant 0.000000e+00 : f32
    %2 = vector.broadcast %cst : f32 to vector<2x64xf32>
    %3 = tpu.concatenate %2, %1 in 0 : vector<2x64xf32>, vector<16x64xf32> -> vector<18x64xf32>
    %cst_2 = arith.constant 0.000000e+00 : f32
    %4 = vector.broadcast %cst_2 : f32 to vector<16x128xf32>
    %5 = vector.extract_strided_slice %3 {offsets = [0, 0], sizes = [16, 64], strides = [1, 1]} : vector<18x64xf32> to vector<16x64xf32>
    %c0_3 = arith.constant 0 : index
    %c0_4 = arith.constant 0 : index
    %c0_5 = arith.constant 0 : index
    %6 = vector.load %arg3[%c0_3, %c0_4, %c0_5] : memref<3x64x128xf32, #tpu.memory_space<vmem>>, vector<1x64x128xf32>
    %7 = vector.shape_cast %6 : vector<1x64x128xf32> to vector<64x128xf32>
    %cst_6 = arith.constant dense<0.000000e+00> : vector<16x128xf32>
    %8 = tpu.matmul %5, %7, %cst_6 {dimension_numbers = #tpu.dot_dimension_numbers<[1], [0], [0], [1], [0, 0, 1, 1], [], []>} : vector<16x64xf32>, vector<64x128xf32>, vector<16x128xf32> -> vector<16x128xf32>
    %9 = arith.addf %4, %8 : vector<16x128xf32>
    %10 = vector.extract_strided_slice %3 {offsets = [1, 0], sizes = [16, 64], strides = [1, 1]} : vector<18x64xf32> to vector<16x64xf32>
    %c1 = arith.constant 1 : index
    %c0_7 = arith.constant 0 : index
    %c0_8 = arith.constant 0 : index
    %11 = vector.load %arg3[%c1, %c0_7, %c0_8] : memref<3x64x128xf32, #tpu.memory_space<vmem>>, vector<1x64x128xf32>
    %12 = vector.shape_cast %11 : vector<1x64x128xf32> to vector<64x128xf32>
    %cst_9 = arith.constant dense<0.000000e+00> : vector<16x128xf32>
    %13 = tpu.matmul %10, %12, %cst_9 {dimension_numbers = #tpu.dot_dimension_numbers<[1], [0], [0], [1], [0, 0, 1, 1], [], []>} : vector<16x64xf32>, vector<64x128xf32>, vector<16x128xf32> -> vector<16x128xf32>
    %14 = arith.addf %9, %13 : vector<16x128xf32>
    %15 = vector.extract_strided_slice %3 {offsets = [2, 0], sizes = [16, 64], strides = [1, 1]} : vector<18x64xf32> to vector<16x64xf32>
    %c2 = arith.constant 2 : index
    %c0_10 = arith.constant 0 : index
    %c0_11 = arith.constant 0 : index
    %16 = vector.load %arg3[%c2, %c0_10, %c0_11] : memref<3x64x128xf32, #tpu.memory_space<vmem>>, vector<1x64x128xf32>
    %17 = vector.shape_cast %16 : vector<1x64x128xf32> to vector<64x128xf32>
    %cst_12 = arith.constant dense<0.000000e+00> : vector<16x128xf32>
    %18 = tpu.matmul %15, %17, %cst_12 {dimension_numbers = #tpu.dot_dimension_numbers<[1], [0], [0], [1], [0, 0, 1, 1], [], []>} : vector<16x64xf32>, vector<64x128xf32>, vector<16x128xf32> -> vector<16x128xf32>
    %19 = arith.addf %14, %18 : vector<16x128xf32>
    %c0_13 = arith.constant 0 : index
    %c0_14 = arith.constant 0 : index
    %c0_15 = arith.constant 0 : index
    %20 = vector.load %arg2[%c0_13, %c0_14, %c0_15] : memref<1x1x128xf32, #tpu.memory_space<vmem>>, vector<1x1x128xf32>
    %21 = vector.shape_cast %20 : vector<1x1x128xf32> to vector<1x128xf32>
    %22 = vector.broadcast %21 : vector<1x128xf32> to vector<16x128xf32>
    %23 = arith.addf %19, %22 : vector<16x128xf32>
    %cst_16 = arith.constant 0.000000e+00 : f32
    %24 = vector.broadcast %cst_16 : f32 to vector<2x128xf32>
    %25 = tpu.concatenate %24, %23 in 0 : vector<2x128xf32>, vector<16x128xf32> -> vector<18x128xf32>
    %cst_17 = arith.constant 0.000000e+00 : f32
    %26 = vector.broadcast %cst_17 : f32 to vector<16x128xf32>
    %27 = vector.extract_strided_slice %25 {offsets = [0, 0], sizes = [16, 128], strides = [1, 1]} : vector<18x128xf32> to vector<16x128xf32>
    %c0_18 = arith.constant 0 : index
    %c0_19 = arith.constant 0 : index
    %c0_20 = arith.constant 0 : index
    %28 = vector.load %arg4[%c0_18, %c0_19, %c0_20] : memref<3x128x128xf32, #tpu.memory_space<vmem>>, vector<1x128x128xf32>
    %29 = vector.shape_cast %28 : vector<1x128x128xf32> to vector<128x128xf32>
    %cst_21 = arith.constant dense<0.000000e+00> : vector<16x128xf32>
    %30 = tpu.matmul %27, %29, %cst_21 {dimension_numbers = #tpu.dot_dimension_numbers<[1], [0], [0], [1], [0, 0, 1, 1], [], []>} : vector<16x128xf32>, vector<128x128xf32>, vector<16x128xf32> -> vector<16x128xf32>
    %31 = arith.addf %26, %30 : vector<16x128xf32>
    %32 = vector.extract_strided_slice %25 {offsets = [1, 0], sizes = [16, 128], strides = [1, 1]} : vector<18x128xf32> to vector<16x128xf32>
    %c1_22 = arith.constant 1 : index
    %c0_23 = arith.constant 0 : index
    %c0_24 = arith.constant 0 : index
    %33 = vector.load %arg4[%c1_22, %c0_23, %c0_24] : memref<3x128x128xf32, #tpu.memory_space<vmem>>, vector<1x128x128xf32>
    %34 = vector.shape_cast %33 : vector<1x128x128xf32> to vector<128x128xf32>
    %cst_25 = arith.constant dense<0.000000e+00> : vector<16x128xf32>
    %35 = tpu.matmul %32, %34, %cst_25 {dimension_numbers = #tpu.dot_dimension_numbers<[1], [0], [0], [1], [0, 0, 1, 1], [], []>} : vector<16x128xf32>, vector<128x128xf32>, vector<16x128xf32> -> vector<16x128xf32>
    %36 = arith.addf %31, %35 : vector<16x128xf32>
    %37 = vector.extract_strided_slice %25 {offsets = [2, 0], sizes = [16, 128], strides = [1, 1]} : vector<18x128xf32> to vector<16x128xf32>
    %c2_26 = arith.constant 2 : index
    %c0_27 = arith.constant 0 : index
    %c0_28 = arith.constant 0 : index
    %38 = vector.load %arg4[%c2_26, %c0_27, %c0_28] : memref<3x128x128xf32, #tpu.memory_space<vmem>>, vector<1x128x128xf32>
    %39 = vector.shape_cast %38 : vector<1x128x128xf32> to vector<128x128xf32>
    %cst_29 = arith.constant dense<0.000000e+00> : vector<16x128xf32>
    %40 = tpu.matmul %37, %39, %cst_29 {dimension_numbers = #tpu.dot_dimension_numbers<[1], [0], [0], [1], [0, 0, 1, 1], [], []>} : vector<16x128xf32>, vector<128x128xf32>, vector<16x128xf32> -> vector<16x128xf32>
    %41 = arith.addf %36, %40 : vector<16x128xf32>
    %c0_30 = arith.constant 0 : index
    %c0_31 = arith.constant 0 : index
    %42 = vector.load %arg5[%c0_30, %c0_31] : memref<1x128xf32, #tpu.memory_space<vmem>>, vector<1x128xf32>
    %43 = vector.broadcast %42 : vector<1x128xf32> to vector<16x128xf32>
    %44 = arith.addf %41, %43 : vector<16x128xf32>
    %cst_32 = arith.constant dense<0.000000e+00> : vector<16xf32>
    %45 = vector.multi_reduction <add>, %44, %cst_32 [1] : vector<16x128xf32> to vector<16xf32>
    %46 = vector.shape_cast %45 : vector<16xf32> to vector<16x1xf32>
    %cst_33 = arith.constant 1.280000e+02 : f32
    %47 = vector.broadcast %cst_33 : f32 to vector<16x1xf32>
    %48 = arith.divf %46, %47 : vector<16x1xf32>
    %49 = vector.broadcast %48 : vector<16x1xf32> to vector<16x128xf32>
    %50 = arith.subf %44, %49 : vector<16x128xf32>
    %51 = arith.mulf %50, %50 : vector<16x128xf32>
    %cst_34 = arith.constant dense<0.000000e+00> : vector<16xf32>
    %52 = vector.multi_reduction <add>, %51, %cst_34 [1] : vector<16x128xf32> to vector<16xf32>
    %53 = vector.shape_cast %52 : vector<16xf32> to vector<16x1xf32>
    %cst_35 = arith.constant 1.280000e+02 : f32
    %54 = vector.broadcast %cst_35 : f32 to vector<16x1xf32>
    %55 = arith.divf %53, %54 : vector<16x1xf32>
    %cst_36 = arith.constant 9.99999974E-6 : f32
    %56 = vector.broadcast %cst_36 : f32 to vector<16x1xf32>
    %57 = arith.addf %55, %56 : vector<16x1xf32>
    %58 = math.rsqrt %57 : vector<16x1xf32>
    %59 = vector.broadcast %58 : vector<16x1xf32> to vector<16x128xf32>
    %60 = arith.mulf %50, %59 : vector<16x128xf32>
    %c0_37 = arith.constant 0 : index
    %c0_38 = arith.constant 0 : index
    %61 = vector.load %arg6[%c0_37, %c0_38] : memref<1x128xf32, #tpu.memory_space<vmem>>, vector<1x128xf32>
    %62 = vector.broadcast %61 : vector<1x128xf32> to vector<16x128xf32>
    %63 = arith.mulf %60, %62 : vector<16x128xf32>
    %c0_39 = arith.constant 0 : index
    %c0_40 = arith.constant 0 : index
    %64 = vector.load %arg7[%c0_39, %c0_40] : memref<1x128xf32, #tpu.memory_space<vmem>>, vector<1x128xf32>
    %65 = vector.broadcast %64 : vector<1x128xf32> to vector<16x128xf32>
    %66 = arith.addf %63, %65 : vector<16x128xf32>
    %c0_41 = arith.constant 0 : index
    %c0_42 = arith.constant 0 : index
    %67 = vector.load %arg8[%c0_41, %c0_42] : memref<128x128xf32, #tpu.memory_space<vmem>>, vector<128x128xf32>
    %cst_43 = arith.constant dense<0.000000e+00> : vector<16x128xf32>
    %68 = tpu.matmul %66, %67, %cst_43 {dimension_numbers = #tpu.dot_dimension_numbers<[1], [0], [0], [1], [0, 0, 1, 1], [], []>} : vector<16x128xf32>, vector<128x128xf32>, vector<16x128xf32> -> vector<16x128xf32>
    %c0_44 = arith.constant 0 : index
    %c0_45 = arith.constant 0 : index
    %69 = vector.load %arg9[%c0_44, %c0_45] : memref<1x128xf32, #tpu.memory_space<vmem>>, vector<1x128xf32>
    %70 = vector.broadcast %69 : vector<1x128xf32> to vector<16x128xf32>
    %71 = arith.addf %68, %70 : vector<16x128xf32>
    %72 = arith.addf %71, %66 : vector<16x128xf32>
    %cst_46 = arith.constant 0.000000e+00 : f32
    %73 = vector.broadcast %cst_46 : f32 to vector<16x128xf32>
    %74 = arith.maximumf %72, %73 : vector<16x128xf32>
    %c0_47 = arith.constant 0 : index
    %c0_48 = arith.constant 0 : index
    %75 = vector.load %arg10[%c0_47, %c0_48] : memref<64x128xf32, #tpu.memory_space<vmem>>, vector<64x128xf32>
    %cst_49 = arith.constant dense<0.000000e+00> : vector<16x128xf32>
    %76 = tpu.matmul %1, %75, %cst_49 {dimension_numbers = #tpu.dot_dimension_numbers<[1], [0], [0], [1], [0, 0, 1, 1], [], []>} : vector<16x64xf32>, vector<64x128xf32>, vector<16x128xf32> -> vector<16x128xf32>
    %c0_50 = arith.constant 0 : index
    %c0_51 = arith.constant 0 : index
    %77 = vector.load %arg11[%c0_50, %c0_51] : memref<1x128xf32, #tpu.memory_space<vmem>>, vector<1x128xf32>
    %78 = vector.broadcast %77 : vector<1x128xf32> to vector<16x128xf32>
    %79 = arith.addf %76, %78 : vector<16x128xf32>
    %80 = arith.addf %74, %79 : vector<16x128xf32>
    %c0_52 = arith.constant 0 : index
    %c0_53 = arith.constant 0 : index
    %c0_54 = arith.constant 0 : index
    %81 = vector.load %arg12[%c0_52, %c0_53, %c0_54] : memref<1x16x128xf32, #tpu.memory_space<vmem>>, vector<1x16x128xf32>
    %82 = vector.shape_cast %81 : vector<1x16x128xf32> to vector<16x128xf32>
    %83 = vector.shape_cast %80 : vector<16x128xf32> to vector<1x16x128xf32>
    tpu.vector_store %arg12[%c0_52, %c0_53, %c0_54], %83 {strides = array<i32>} : memref<1x16x128xf32, #tpu.memory_space<vmem>>, vector<1x16x128xf32>,
    return
  }
  func.func @transform_0(%arg0: i32) -> (i32, i32, i32) {
    %c0_i32 = arith.constant 0 : i32
    %c0_i32_0 = arith.constant 0 : i32
    %c0_i32_1 = arith.constant 0 : i32
    return %arg0, %c0_i32, %c0_i32_0 : i32, i32, i32
  }
  func.func @transform_1(%arg0: i32) -> (i32, i32, i32) {
    %c0_i32 = arith.constant 0 : i32
    %c0_i32_0 = arith.constant 0 : i32
    %c0_i32_1 = arith.constant 0 : i32
    return %arg0, %c0_i32, %c0_i32_0 : i32, i32, i32
  }
  func.func @transform_2(%arg0: i32) -> (i32, i32, i32) {
    %c0_i32 = arith.constant 0 : i32
    %c0_i32_0 = arith.constant 0 : i32
    %c0_i32_1 = arith.constant 0 : i32
    %c0_i32_2 = arith.constant 0 : i32
    return %c0_i32, %c0_i32_0, %c0_i32_1 : i32, i32, i32
  }
  func.func @transform_3(%arg0: i32) -> (i32, i32, i32) {
    %c0_i32 = arith.constant 0 : i32
    %c0_i32_0 = arith.constant 0 : i32
    %c0_i32_1 = arith.constant 0 : i32
    %c0_i32_2 = arith.constant 0 : i32
    return %c0_i32, %c0_i32_0, %c0_i32_1 : i32, i32, i32
  }
  func.func @transform_4(%arg0: i32) -> (i32, i32) {
    %c0_i32 = arith.constant 0 : i32
    %c0_i32_0 = arith.constant 0 : i32
    %c0_i32_1 = arith.constant 0 : i32
    return %c0_i32, %c0_i32_0 : i32, i32
  }
  func.func @transform_5(%arg0: i32) -> (i32, i32) {
    %c0_i32 = arith.constant 0 : i32
    %c0_i32_0 = arith.constant 0 : i32
    %c0_i32_1 = arith.constant 0 : i32
    return %c0_i32, %c0_i32_0 : i32, i32
  }
  func.func @transform_6(%arg0: i32) -> (i32, i32) {
    %c0_i32 = arith.constant 0 : i32
    %c0_i32_0 = arith.constant 0 : i32
    %c0_i32_1 = arith.constant 0 : i32
    return %c0_i32, %c0_i32_0 : i32, i32
  }
  func.func @transform_7(%arg0: i32) -> (i32, i32) {
    %c0_i32 = arith.constant 0 : i32
    %c0_i32_0 = arith.constant 0 : i32
    %c0_i32_1 = arith.constant 0 : i32
    return %c0_i32, %c0_i32_0 : i32, i32
  }
  func.func @transform_8(%arg0: i32) -> (i32, i32) {
    %c0_i32 = arith.constant 0 : i32
    %c0_i32_0 = arith.constant 0 : i32
    %c0_i32_1 = arith.constant 0 : i32
    return %c0_i32, %c0_i32_0 : i32, i32
  }
  func.func @transform_9(%arg0: i32) -> (i32, i32) {
    %c0_i32 = arith.constant 0 : i32
    %c0_i32_0 = arith.constant 0 : i32
    %c0_i32_1 = arith.constant 0 : i32
    return %c0_i32, %c0_i32_0 : i32, i32
  }
  func.func @transform_10(%arg0: i32) -> (i32, i32) {
    %c0_i32 = arith.constant 0 : i32
    %c0_i32_0 = arith.constant 0 : i32
    %c0_i32_1 = arith.constant 0 : i32
    return %c0_i32, %c0_i32_0 : i32, i32
  }
  func.func @transform_11(%arg0: i32) -> (i32, i32, i32) {
    %c0_i32 = arith.constant 0 : i32
    %c0_i32_0 = arith.constant 0 : i32
    %c0_i32_1 = arith.constant 0 : i32
    return %arg0, %c0_i32, %c0_i32_0 : i32, i32, i32
  }
}

</mosaic_0001>

<bundles_post_ra>
// kernel: tile.28
= control target key start
LH: loop header
LB: loop body
LE: loop exit
PB: predicated region body
PF: predicated region fallthrough
CT: control target
= control target key end

     0   :  { %s28_s0 = inlined_call_operand.vmem [shape: f32[8], index: 0, kind: input, shape index: {}]   ;;  %s29_s1 = inlined_call_operand.vmem [shape: f32[16,8], index: 1, kind: output, shape index: {}]  }
   0x1   :  { %v4_v0 = vld [vmem:[%s28_s0] ss:$0 sm:$0xff] }
   0x2   :  { %5 = vst [vmem:[%s29_s1] sm:$0xff] %v4_v0  ;;  %8 = vst [vmem:[%s29_s1 + $0x8] sm:$0xff] %v4_v0 }

// kernel: downblock_forward.1
= control target key start
LH: loop header
LB: loop body
LE: loop exit
PB: predicated region body
PF: predicated region fallthrough
CT: control target
= control target key end

     0   :  { %s1998_s17 = smov 0   ;;  %s2376_s0 = inlined_call_operand.vmem [shape: f32[2,16,64], index: 0, kind: input, shape index: {}]   ;;  %s2377_s1 = inlined_call_operand.vmem [shape: f32[2,1,128], index: 1, kind: input, shape index: {}]   ;;  %s2378_s2 = inlined_call_operand.vmem [shape: f32[3,64,128], index: 2, kind: input, shape index: {}]   ;;  %s2379_s3 = inlined_call_operand.vmem [shape: f32[3,128,128], index: 3, kind: input, shape index: {}]   ;;  %s2380_s4 = inlined_call_operand.vmem [shape: f32[1,128], index: 4, kind: input, shape index: {}]   ;;  %s2381_s5 = inlined_call_operand.vmem [shape: f32[1,128], index: 5, kind: input, shape index: {}]   ;;  %s2382_s6 = inlined_call_operand.vmem [shape: f32[1,128], index: 6, kind: input, shape index: {}]   ;;  %s2383_s7 = inlined_call_operand.vmem [shape: f32[128,128], index: 7, kind: input, shape index: {}]   ;;  %s2384_s8 = inlined_call_operand.vmem [shape: f32[1,128], index: 8, kind: input, shape index: {}]   ;;  %s2385_s9 = inlined_call_operand.vmem [shape: f32[64,128], index: 9, kind: input, shape index: {}]   ;;  %s2386_s10 = inlined_call_operand.vmem [shape: f32[1,128], index: 10, kind: input, shape index: {}]   ;;  %s2387_s11 = inlined_call_operand.vmem [shape: f32[2,16,128], index: 11, kind: output, shape index: {}]  }
   0x1 LB: > { %s1313_s18 = sadd.s32 4294967295, %s1936_s17   ;;  %p1317_p0 = scmp.ge.s32.totalorder %s1936_s17, 1  ;;  %s1936_s17 = sphi %s1998_s17, %s21_s17  }
   0x2   : > { %p345_p1 = scmp.lt.s32.totalorder %s1936_s17, 3 }
   0x4   : > { %p346_p2 = pnand %p1317_p0, %p345_p1 }
   0x5   : > { %v1322_v0 = vld [vmem:[%s2378_s2 + $0x40] sm:$0xff] (!%p346_p2)  ;;  %v1323_v1 = vld [vmem:[%s2378_s2 + $0x48] sm:$0xff] (!%p346_p2)  ;;  %v1324_v2 = vld [vmem:[%s2378_s2 + $0x50] sm:$0xff] (!%p346_p2)  ;;  %p388_p3 = scmp.lt.s32.totalorder (!%p346_p2), %s1313_s18, 1  ;;  %vm405_vm0 = vcmask (!%p346_p2), 1041408   ;;  %vm429_vm1 = vcmask (!%p346_p2), 1046528  }
   0x6   : > { %349 = sbr.rel (%p346_p2) target bundleno = 1106 (0x452), region = 64  ;;  %v1718_v3 = vpack.c.bf16 (!%p346_p2), %v1323_v1, %v1322_v0  ;;  %v1325_v4 = vld [vmem:[%s2378_s2 + $0x58] sm:$0xff] (!%p346_p2)  ;;  %v1326_v6 = vld [vmem:[%s2378_s2 + $0x60] sm:$0xff] (!%p346_p2)  ;;  %v1327_v7 = vld [vmem:[%s2378_s2 + $0x68] sm:$0xff] (!%p346_p2)  ;;  %vm435_vm2 = vcmask (!%p346_p2), 523264   ;;  %vm603_vm3 = vcmask (!%p346_p2), 1045504  }
   0x7   : > { %v1722_v5 = vpack.c.bf16 (!%p346_p2), %v1325_v4, %v1324_v2  ;;  %v1726_v8 = vpack.c.bf16 (!%p346_p2), %v1327_v7, %v1326_v6  ;;  %v1328_v9 = vld [vmem:[%s2378_s2 + $0x70] sm:$0xff] (!%p346_p2)  ;;  %v1329_v10 = vld [vmem:[%s2378_s2 + $0x78] sm:$0xff] (!%p346_p2)  ;;  %v1345_v15 = vld [vmem:[%s2379_s3 + $0x80] sm:$0xff] (!%p346_p2) }
   0x8   : > { %1719 = vmatprep.subr.bf16.mxu0 (!%p346_p2), %v1718_v3  ;;  %v1730_v16 = vpack.c.bf16 (!%p346_p2), %v1329_v10, %v1328_v9  ;;  %v1346_v19 = vld [vmem:[%s2379_s3 + $0x88] sm:$0xff] (!%p346_p2)  ;;  %v1347_v20 = vld [vmem:[%s2379_s3 + $0x90] sm:$0xff] (!%p346_p2)  ;;  %v1348_v21 = vld [vmem:[%s2379_s3 + $0x98] sm:$0xff] (!%p346_p2) }
   0x9   : > { %1721 = vmatpush3.bf16.msra.mxu0 (!%p346_p2), %v1718_v3  ;;  %v411_v24 = vld [vmem:[%s2378_s2] sm:$0xff] (!%p346_p2)  ;;  %v412_v25 = vld [vmem:[%s2378_s2 + $0x8] sm:$0xff] (!%p346_p2)  ;;  %v1766_v26 = vpack.c.bf16 (!%p346_p2), %v1346_v19, %v1345_v15  ;;  %v1770_v29 = vpack.c.bf16 (!%p346_p2), %v1348_v21, %v1347_v20  ;;  %v413_v31 = vld [vmem:[%s2378_s2 + $0x10] sm:$0xff] (!%p346_p2) }
   0xa   : > { %1723 = vmatprep.subr.bf16.mxu0 (!%p346_p2), %v1722_v5  ;;  %v1734_v30 = vpack.c.bf16 (!%p346_p2), %v412_v25, %v411_v24  ;;  %v414_v32 = vld [vmem:[%s2378_s2 + $0x18] sm:$0xff] (!%p346_p2)  ;;  %v1349_v33 = vld [vmem:[%s2379_s3 + $0xa0] sm:$0xff] (!%p346_p2)  ;;  %v1350_v34 = vld [vmem:[%s2379_s3 + $0xa8] sm:$0xff] (!%p346_p2) }
   0xb   : > { %1767 = vmatprep.subr.bf16.mxu1 (!%p346_p2), %v1766_v26  ;;  %v1738_v36 = vpack.c.bf16 (!%p346_p2), %v414_v32, %v413_v31  ;;  %v1774_v37 = vpack.c.bf16 (!%p346_p2), %v1350_v34, %v1349_v33  ;;  %v1351_v38 = vld [vmem:[%s2379_s3 + $0xb0] sm:$0xff] (!%p346_p2)  ;;  %v1352_v39 = vld [vmem:[%s2379_s3 + $0xb8] sm:$0xff] (!%p346_p2)  ;;  %v415_v40 = vld [vmem:[%s2378_s2 + $0x20] sm:$0xff] (!%p346_p2) }
   0xc   : > { %1769 = vmatpush3.bf16.msra.mxu1 (!%p346_p2), %v1766_v26  ;;  %v416_v41 = vld [vmem:[%s2378_s2 + $0x28] sm:$0xff] (!%p346_p2)  ;;  %v1778_v42 = vpack.c.bf16 (!%p346_p2), %v1352_v39, %v1351_v38  ;;  %v1353_v44 = vld [vmem:[%s2379_s3 + $0xc0] sm:$0xff] (!%p346_p2)  ;;  %v417_v46 = vld [vmem:[%s2378_s2 + $0x30] sm:$0xff] (!%p346_p2) }
   0xd   : > { %s2389_s18 = smov (!%p388_p3, %s1313_s18), 1  ;;  %1725 = vmatpush3.bf16.msra.mxu0 %v1722_v5  ;;  %1771 = vmatprep.subr.bf16.mxu1 %v1770_v29  ;;  %v1742_v43 = vpack.c.bf16 %v416_v41, %v415_v40  ;;  %v1354_v45 = vld [vmem:[%s2379_s3 + $0xc8] sm:$0xff]  ;;  %v418_v47 = vld [vmem:[%s2378_s2 + $0x38] sm:$0xff]  ;;  %v1355_v50 = vld [vmem:[%s2379_s3 + $0xd0] sm:$0xff] }
   0xe   : > { %s1388_s12 = sshll.u32 %s2389_s18, 4  ;;  %1727 = vmatprep.subr.bf16.mxu0 %v1726_v8  ;;  %v1782_v48 = vpack.c.bf16 %v1354_v45, %v1353_v44  ;;  %v1746_v49 = vpack.c.bf16 %v418_v47, %v417_v46  ;;  %v1356_v51 = vld [vmem:[%s2379_s3 + $0xd8] sm:$0xff]  ;;  %v1334_v52 = vld [vmem:[%s2378_s2 + $0x80] sm:$0xff]  ;;  %v1335_v53 = vld [vmem:[%s2378_s2 + $0x88] sm:$0xff]  ;;  %s395_s28 = scalar_lea.vmem %s2377_s1, %s2389_s18 }
   0xf   : > { %s392_s19 = scalar_lea.vmem %s2376_s0, %s1388_s12  ;;  %v1786_v54 = vpack.c.bf16 %v1356_v51, %v1355_v50  ;;  %v1750_v55 = vpack.c.bf16 %v1335_v53, %v1334_v52  ;;  %v1336_v58 = vld [vmem:[%s2378_s2 + $0x90] sm:$0xff]  ;;  %v1337_v59 = vld [vmem:[%s2378_s2 + $0x98] sm:$0xff]  ;;  %v1338_v62 = vld [vmem:[%s2378_s2 + $0xa0] sm:$0xff]  ;;  %s400_s21 = scalar_lea.vmem %s2387_s11, %s1388_s12 }
  0x10   : > { %v2038_v11 = vld [vmem:[%s392_s19] sm:$0xff]  ;;  %v2040_v12 = vld [vmem:[%s392_s19 + $0x8] sm:$0xff]  ;;  %1773 = vmatpush3.bf16.msra.mxu1 %v1770_v29  ;;  %v1754_v60 = vpack.c.bf16 %v1337_v59, %v1336_v58  ;;  %v1340_v1 = vld [vmem:[%s2378_s2 + $0xb0] sm:$0xff] }
  0x11   : > { %v406_v13 = vrot.slane %v2038_v11, 6  ;;  %v2044_v14 = vrot.slane %v2040_v12, 6  ;;  %1729 = vmatpush3.bf16.msra.mxu0 %v1726_v8  ;;  %1775 = vmatprep.subr.bf16.mxu1 %v1774_v37  ;;  %v1339_v63 = vld [vmem:[%s2378_s2 + $0xa8] sm:$0xff]  ;;  %v1341_v2 = vld [vmem:[%s2378_s2 + $0xb8] sm:$0xff]  ;;  %v1357_v6 = vld [vmem:[%s2379_s3 + $0xe0] sm:$0xff] }
  0x12   : > { %1731 = vmatprep.subr.bf16.mxu0 %v1730_v16  ;;  %v1758_v0 = vpack.c.bf16 %v1339_v63, %v1338_v62  ;;  %v1762_v3 = vpack.c.bf16 %v1341_v2, %v1340_v1  ;;  %v1358_v7 = vld [vmem:[%s2379_s3 + $0xe8] sm:$0xff]  ;;  %v1359_v9 = vld [vmem:[%s2379_s3 + $0xf0] sm:$0xff]  ;;  %v1360_v10 = vld [vmem:[%s2379_s3 + $0xf8] sm:$0xff] }
  0x13   : > { %v2051_v17 = vsel %vm405_vm0, %v406_v13, %v2044_v14  ;;  %v2054_v18 = vsel %vm405_vm0, 0.0, %v406_v13  ;;  %v433_v28 = vrot.slane %v2044_v14, 1  ;;  %v607_v4 = vrot.slane %v2044_v14, 2  ;;  %v707_v14 = vld [vmem:[%s2379_s3] sm:$0xff]  ;;  %v708_v15 = vld [vmem:[%s2379_s3 + $0x8] sm:$0xff]  ;;  %v709_v24 = vld [vmem:[%s2379_s3 + $0x10] sm:$0xff] }
  0x14   : > { %v430_v22 = vrot.slane %v2054_v18, 1  ;;  %v431_v23 = vrot.slane %v2051_v17, 1  ;;  %1777 = vmatpush3.bf16.msra.mxu1 %v1774_v37  ;;  %v604_v56 = vrot.slane %v2054_v18, 2  ;;  %v605_v57 = vrot.slane %v2051_v17, 2  ;;  %v710_v25 = vld [vmem:[%s2379_s3 + $0x18] sm:$0xff]  ;;  %vm1361_vm4 = vmneg %vm405_vm0  ;;  %v711_v39 = vld [vmem:[%s2379_s3 + $0x20] sm:$0xff] }
  0x15   : > { %1733 = vmatpush3.bf16.msra.mxu0 %v1730_v16  ;;  %1779 = vmatprep.subr.bf16.mxu1 %v1778_v42  ;;  %v1790_v8 = vpack.c.bf16 %v1358_v7, %v1357_v6  ;;  %v1794_v13 = vpack.c.bf16 %v1360_v10, %v1359_v9  ;;  %v1798_v16 = vpack.c.bf16 %v708_v15, %v707_v14  ;;  %v712_v40 = vld [vmem:[%s2379_s3 + $0x28] sm:$0xff]  ;;  %v715_v45 = vld [vmem:[%s2379_s3 + $0x40] sm:$0xff]  ;;  %v1369_v2 = vld [vmem:[%s2379_s3 + $0x130] sm:$0xff] }
  0x16   : > { %v432_v27 = vsel %vm429_vm1, %v430_v22, %v431_v23  ;;  %v434_v35 = vsel %vm429_vm1, %v431_v23, %v433_v28  ;;  %1735 = vmatprep.subr.bf16.mxu0 %v1734_v30  ;;  %v606_v61 = vsel %vm603_vm3, %v604_v56, %v605_v57  ;;  %v608_v5 = vsel %vm603_vm3, %v605_v57, %v607_v4  ;;  %v716_v46 = vld [vmem:[%s2379_s3 + $0x48] sm:$0xff]  ;;  %v719_v51 = vld [vmem:[%s2379_s3 + $0x60] sm:$0xff]  ;;  %v1374_v9 = vld [vmem:[%s2379_s3 + $0x158] sm:$0xff] }
  0x17   : > { %1518 = vmatprep.mubr.msk.f32.mxu0 %vm435_vm2, %v432_v27  ;;  %v1802_v34 = vpack.c.bf16 %v710_v25, %v709_v24  ;;  %v1806_v41 = vpack.c.bf16 %v712_v40, %v711_v39  ;;  %v1814_v47 = vpack.c.bf16 %v716_v46, %v715_v45  ;;  %v720_v52 = vld [vmem:[%s2379_s3 + $0x68] sm:$0xff]  ;;  %v1363_v57 = vld [vmem:[%s2379_s3 + $0x100] sm:$0xff] }
  0x18   : > { %1519 = vmatmul.mubr.msk.f32.vlgmr.msra.gmra.mrb[0].mxu0 %vm435_vm2, %v434_v35  ;;  %1781 = vmatpush3.bf16.msra.mxu1 %v1778_v42  ;;  %v713_v42 = vld [vmem:[%s2379_s3 + $0x30] sm:$0xff]  ;;  %v1822_v53 = vpack.c.bf16 %v720_v52, %v719_v51  ;;  %v1364_v58 = vld [vmem:[%s2379_s3 + $0x108] sm:$0xff]  ;;  %v1367_v63 = vld [vmem:[%s2379_s3 + $0x120] sm:$0xff] }
  0x19   : > { %1737 = vmatpush3.bf16.msra.mxu0 %v1734_v30  ;;  %1537 = vmatprep.mubr.msk.f32.mxu0 %vm435_vm2, %v2054_v18  ;;  %v1830_v59 = vpack.c.bf16 %v1364_v58, %v1363_v57  ;;  %v1372_v6 = vld [vmem:[%s2379_s3 + $0x148] sm:$0xff]  ;;  %v1049_v24 = vld [vmem:[%s2383_s7] sm:$0xff] }
  0x1a   : > { %1739 = vmatprep.subr.bf16.mxu0 %v1738_v36  ;;  %1783 = vmatprep.subr.bf16.mxu1 %v1782_v48  ;;  %v1376_v14 = vld [vmem:[%s2379_s3 + $0x168] sm:$0xff] }
  0x1b   : > { %v1050_v25 = vld [vmem:[%s2383_s7 + $0x8] sm:$0xff] }
  0x1c   : > { %1785 = vmatpush3.bf16.msra.mxu1 %v1782_v48  ;;  %v717_v48 = vld [vmem:[%s2379_s3 + $0x50] sm:$0xff]  ;;  %v1054_v39 = vld [vmem:[%s2383_s7 + $0x28] sm:$0xff] }
  0x1d   : > { %1741 = vmatpush3.bf16.msra.mxu0 %v1738_v36  ;;  %1787 = vmatprep.subr.bf16.mxu1 %v1786_v54  ;;  %v1058_v45 = vld [vmem:[%s2383_s7 + $0x48] sm:$0xff] }
  0x1e   : > { %1743 = vmatprep.subr.bf16.mxu0 %v1742_v43  ;;  %v1062_v51 = vld [vmem:[%s2383_s7 + $0x68] sm:$0xff] }
  0x1f   : > { %v1152_v57 = vld [vmem:[%s2385_s9 + $0x8] sm:$0xff] }
  0x20   : > { %1789 = vmatpush3.bf16.msra.mxu1 %v1786_v54  ;;  %v721_v54 = vld [vmem:[%s2379_s3 + $0x70] sm:$0xff] }
  0x21   : > { %1745 = vmatpush3.bf16.msra.mxu0 %v1742_v43  ;;  %1791 = vmatprep.subr.bf16.mxu1 %v1790_v8  ;;  %v714_v43 = vld [vmem:[%s2379_s3 + $0x38] sm:$0xff] }
  0x22   : > { %1747 = vmatprep.subr.bf16.mxu0 %v1746_v49  ;;  %v1810_v44 = vpack.c.bf16 %v714_v43, %v713_v42  ;;  %v1056_v42 = vld [vmem:[%s2383_s7 + $0x38] sm:$0xff] }
  0x24   : > { %1793 = vmatpush3.bf16.msra.mxu1 %v1790_v8  ;;  %v1373_v8 = vld [vmem:[%s2379_s3 + $0x150] sm:$0xff] }
  0x25   : > { %1749 = vmatpush3.bf16.msra.mxu0 %v1746_v49  ;;  %1795 = vmatprep.subr.bf16.mxu1 %v1794_v13  ;;  %v718_v49 = vld [vmem:[%s2379_s3 + $0x58] sm:$0xff]  ;;  %v1850_v10 = vpack.c.bf16 %v1374_v9, %v1373_v8  ;;  %v1153_v9 = vld [vmem:[%s2385_s9 + $0x10] sm:$0xff] }
  0x26   : > { %1751 = vmatprep.subr.bf16.mxu0 %v1750_v55  ;;  %v1818_v50 = vpack.c.bf16 %v718_v49, %v717_v48  ;;  %v1060_v48 = vld [vmem:[%s2383_s7 + $0x58] sm:$0xff]  ;;  %v1061_v49 = vld [vmem:[%s2383_s7 + $0x60] sm:$0xff] }
  0x27   : > { %v1886_v52 = vpack.c.bf16 %v1062_v51, %v1061_v49 }
  0x28   : > { %1538 = vmatmul.mubr.msk.f32.vlgmr.msra.gmra.mrb[0].mxu0 %vm435_vm2, %v2051_v17  ;;  %1797 = vmatpush3.bf16.msra.mxu1 %v1794_v13  ;;  %v1344_v17 = vld [vmem:[%s395_s28] ss:$0 sm:$0xff] }
  0x29   : > { %1753 = vmatpush3.bf16.msra.mxu0 %v1750_v55  ;;  %1556 = vmatprep.mubr.msk.f32.mxu0 %vm435_vm2, %v606_v61  ;;  %v722_v55 = vld [vmem:[%s2379_s3 + $0x78] sm:$0xff]  ;;  %v1375_v13 = vld [vmem:[%s2379_s3 + $0x160] sm:$0xff] }
  0x2a   : > { %1755 = vmatprep.subr.bf16.mxu0 %v1754_v60  ;;  %1799 = vmatprep.subr.bf16.mxu1 %v1798_v16  ;;  %v1826_v56 = vpack.c.bf16 %v722_v55, %v721_v54  ;;  %v1366_v61 = vld [vmem:[%s2379_s3 + $0x118] sm:$0xff]  ;;  %v1854_v15 = vpack.c.bf16 %v1376_v14, %v1375_v13 }
  0x2b   : > { %v1064_v54 = vld [vmem:[%s2383_s7 + $0x78] sm:$0xff] }
  0x2d   : > { %1757 = vmatpush3.bf16.msra.mxu0 %v1754_v60  ;;  %v1365_v60 = vld [vmem:[%s2379_s3 + $0x110] sm:$0xff] }
  0x2e   : > { %1759 = vmatprep.subr.bf16.mxu0 %v1758_v0  ;;  %v1834_v62 = vpack.c.bf16 %v1366_v61, %v1365_v60 }
  0x31   : > { %1761 = vmatpush3.bf16.msra.mxu0 %v1758_v0  ;;  %v1368_v0 = vld [vmem:[%s2379_s3 + $0x128] sm:$0xff] }
  0x32   : > { %1763 = vmatprep.subr.bf16.mxu0 %v1762_v3  ;;  %v1838_v1 = vpack.c.bf16 %v1368_v0, %v1367_v63 }
  0x35   : > { %1765 = vmatpush3.bf16.msra.mxu0 %v1762_v3  ;;  %v1370_v3 = vld [vmem:[%s2379_s3 + $0x138] sm:$0xff] }
  0x36   : > { %v1842_v4 = vpack.c.bf16 %v1370_v3, %v1369_v2  ;;  %v1380_v2 = vld [vmem:[%s2381_s5] ss:$0 sm:$0xff] }
  0x38   : > { %1557 = vmatmul.mubr.msk.f32.vlgmr.msra.gmra.mrb[0].mxu0 %vm435_vm2, %v608_v5  ;;  %v1371_v5 = vld [vmem:[%s2379_s3 + $0x140] sm:$0xff] }
  0x39   : > { %v1846_v7 = vpack.c.bf16 %v1372_v6, %v1371_v5 }
 0x10b   : > { %v1558_v18 = vpop.f32.mrb[0].mxu0 }
 0x10c   : > { %v698_v19 = vadd.f32 %v1558_v18, %v1344_v17  ;;  %v679_v20 = vpop.f32.mrb[1].mxu0 }
 0x10d   : > { %v697_v21 = vadd.f32 %v1344_v17, %v679_v20  ;;  %v1378_v17 = vld [vmem:[%s2379_s3 + $0x178] sm:$0xff] }
 0x10e   : > { %v702_v22 = vrot.slane %v698_v19, 6  ;;  %v1379_v19 = vld [vmem:[%s2380_s4] ss:$0 sm:$0xff] }
 0x10f   : > { %v701_v23 = vrot.slane %v697_v21, 6 }
 0x110   : > { %v744_v26 = vrot.slane %v702_v22, 1  ;;  %v918_v27 = vrot.slane %v702_v22, 2 }
 0x111   : > { %v703_v28 = vsel %vm405_vm0, %v701_v23, %v702_v22  ;;  %v706_v29 = vsel %vm405_vm0, 0.0, %v701_v23 }
 0x112   : > { %v741_v30 = vrot.slane %v706_v29, 1  ;;  %v742_v31 = vrot.slane %v703_v28, 1  ;;  %v915_v32 = vrot.slane %v706_v29, 2  ;;  %v916_v33 = vrot.slane %v703_v28, 2 }
 0x114   : > { %v743_v35 = vsel %vm429_vm1, %v741_v30, %v742_v31  ;;  %v745_v36 = vsel %vm429_vm1, %v742_v31, %v744_v26  ;;  %v917_v37 = vsel %vm603_vm3, %v915_v32, %v916_v33  ;;  %v2190_v38 = vsel %vm603_vm3, %v916_v33, %v918_v27  ;;  %v1051_v26 = vld [vmem:[%s2383_s7 + $0x10] sm:$0xff] }
 0x115   : > { %1591 = vmatprep.mubr.f32.mxu1 %v743_v35  ;;  %v1862_v27 = vpack.c.bf16 %v1050_v25, %v1049_v24 }
 0x116   : > { %1592 = vmatmul.mubr.f32.vlgmr.msra.gmra.mrb[0].mxu1 %v745_v36 }
 0x117   : > { %1801 = vmatpush3.bf16.msra.mxu1 %v1798_v16  ;;  %1626 = vmatprep.mubr.msk.f32.mxu1 %vm1361_vm4, %v701_v23  ;;  %v1377_v16 = vld [vmem:[%s2379_s3 + $0x170] sm:$0xff] }
 0x118   : > { %1803 = vmatprep.subr.bf16.mxu1 %v1802_v34  ;;  %v1858_v18 = vpack.c.bf16 %v1378_v17, %v1377_v16  ;;  %1863 = vmatprep.subr.bf16.mxu0 %v1862_v27  ;;  %v1155_v16 = vld [vmem:[%s2385_s9 + $0x20] sm:$0xff]  ;;  %v1156_v17 = vld [vmem:[%s2385_s9 + $0x28] sm:$0xff] }
 0x119   : > { %1865 = vmatpush3.bf16.msra.mxu0 %v1862_v27 }
 0x11b   : > { %1805 = vmatpush3.bf16.msra.mxu1 %v1802_v34 }
 0x11c   : > { %1807 = vmatprep.subr.bf16.mxu1 %v1806_v41 }
 0x11f   : > { %1809 = vmatpush3.bf16.msra.mxu1 %v1806_v41  ;;  %v1055_v41 = vld [vmem:[%s2383_s7 + $0x30] sm:$0xff] }
 0x120   : > { %1811 = vmatprep.subr.bf16.mxu1 %v1810_v44  ;;  %v1874_v43 = vpack.c.bf16 %v1056_v42, %v1055_v41 }
 0x123   : > { %1813 = vmatpush3.bf16.msra.mxu1 %v1810_v44  ;;  %v1057_v44 = vld [vmem:[%s2383_s7 + $0x40] sm:$0xff] }
 0x124   : > { %1815 = vmatprep.subr.bf16.mxu1 %v1814_v47  ;;  %v1878_v46 = vpack.c.bf16 %v1058_v45, %v1057_v44 }
 0x127   : > { %1817 = vmatpush3.bf16.msra.mxu1 %v1814_v47  ;;  %v1059_v47 = vld [vmem:[%s2383_s7 + $0x50] sm:$0xff] }
 0x128   : > { %1819 = vmatprep.subr.bf16.mxu1 %v1818_v50 }
 0x12b   : > { %1821 = vmatpush3.bf16.msra.mxu1 %v1818_v50  ;;  %v1882_v50 = vpack.c.bf16 %v1060_v48, %v1059_v47 }
 0x12c   : > { %1823 = vmatprep.subr.bf16.mxu1 %v1822_v53 }
 0x12f   : > { %1825 = vmatpush3.bf16.msra.mxu1 %v1822_v53  ;;  %v1063_v53 = vld [vmem:[%s2383_s7 + $0x70] sm:$0xff] }
 0x130   : > { %1827 = vmatprep.subr.bf16.mxu1 %v1826_v56  ;;  %v1890_v55 = vpack.c.bf16 %v1064_v54, %v1063_v53 }
 0x133   : > { %1829 = vmatpush3.bf16.msra.mxu1 %v1826_v56  ;;  %v1151_v56 = vld [vmem:[%s2385_s9] sm:$0xff] }
 0x134   : > { %1831 = vmatprep.subr.bf16.mxu1 %v1830_v59  ;;  %v1894_v58 = vpack.c.bf16 %v1152_v57, %v1151_v56 }
 0x136   : > { %1627 = vmatmul.mubr.f32.vlgmr.msra.gmra.mrb[0].mxu1 %v703_v28  ;;  %v1052_v28 = vld [vmem:[%s2383_s7 + $0x18] sm:$0xff] }
 0x137   : > { %1833 = vmatpush3.bf16.msra.mxu1 %v1830_v59  ;;  %1661 = vmatprep.mubr.f32.mxu1 %v917_v37  ;;  %v1866_v29 = vpack.c.bf16 %v1052_v28, %v1051_v26  ;;  %v1383_v28 = vld [vmem:[%s2386_s10] ss:$0 sm:$0xff] }
 0x138   : > { %1835 = vmatprep.subr.bf16.mxu1 %v1834_v62 }
 0x139   : > { %1867 = vmatprep.subr.bf16.mxu0 %v1866_v29 }
 0x13a   : > { %1869 = vmatpush3.bf16.msra.mxu0 %v1866_v29 }
 0x13b   : > { %1837 = vmatpush3.bf16.msra.mxu1 %v1834_v62 }
 0x13c   : > { %1839 = vmatprep.subr.bf16.mxu1 %v1838_v1 }
 0x13f   : > { %1841 = vmatpush3.bf16.msra.mxu1 %v1838_v1 }
 0x140   : > { %1843 = vmatprep.subr.bf16.mxu1 %v1842_v4 }
 0x143   : > { %1845 = vmatpush3.bf16.msra.mxu1 %v1842_v4  ;;  %v1381_v4 = vld [vmem:[%s2382_s6] ss:$0 sm:$0xff] }
 0x144   : > { %1847 = vmatprep.subr.bf16.mxu1 %v1846_v7 }
 0x147   : > { %1849 = vmatpush3.bf16.msra.mxu1 %v1846_v7 }
 0x148   : > { %1851 = vmatprep.subr.bf16.mxu1 %v1850_v10 }
 0x14b   : > { %1853 = vmatpush3.bf16.msra.mxu1 %v1850_v10  ;;  %v1154_v10 = vld [vmem:[%s2385_s9 + $0x18] sm:$0xff] }
 0x14c   : > { %1855 = vmatprep.subr.bf16.mxu1 %v1854_v15 }
 0x14f   : > { %1857 = vmatpush3.bf16.msra.mxu1 %v1854_v15  ;;  %v1898_v15 = vpack.c.bf16 %v1154_v10, %v1153_v9 }
 0x150   : > { %1859 = vmatprep.subr.bf16.mxu1 %v1858_v18 }
 0x153   : > { %1861 = vmatpush3.bf16.msra.mxu1 %v1858_v18  ;;  %v1902_v18 = vpack.c.bf16 %v1156_v17, %v1155_v16 }
 0x156   : > { %1662 = vmatmul.mubr.f32.vlgmr.msra.gmra.mrb[0].mxu1 %v2190_v38  ;;  %v1053_v38 = vld [vmem:[%s2383_s7 + $0x20] sm:$0xff] }
 0x157   : > { %v1870_v40 = vpack.c.bf16 %v1054_v39, %v1053_v38 }
 0x159   : > { %1871 = vmatprep.subr.bf16.mxu0 %v1870_v40 }
 0x15a   : > { %1873 = vmatpush3.bf16.msra.mxu0 %v1870_v40 }
 0x15b   : > { %1875 = vmatprep.subr.bf16.mxu0 %v1874_v43 }
 0x15e   : > { %1877 = vmatpush3.bf16.msra.mxu0 %v1874_v43 }
 0x15f   : > { %1879 = vmatprep.subr.bf16.mxu0 %v1878_v46 }
 0x162   : > { %1881 = vmatpush3.bf16.msra.mxu0 %v1878_v46 }
 0x163   : > { %1883 = vmatprep.subr.bf16.mxu0 %v1882_v50 }
 0x166   : > { %1885 = vmatpush3.bf16.msra.mxu0 %v1882_v50 }
 0x167   : > { %1887 = vmatprep.subr.bf16.mxu0 %v1886_v52 }
 0x16a   : > { %1889 = vmatpush3.bf16.msra.mxu0 %v1886_v52 }
 0x16b   : > { %1891 = vmatprep.subr.bf16.mxu0 %v1890_v55 }
 0x16e   : > { %1893 = vmatpush3.bf16.msra.mxu0 %v1890_v55 }
 0x16f   : > { %1895 = vmatprep.subr.bf16.mxu0 %v1894_v58 }
 0x229   : > { %v1663_v20 = vpop.f32.mrb[0].mxu1 }
 0x22a   : > { %v988_v21 = vpop.f32.mrb[1].mxu1  ;;  %v1007_v23 = vadd.f32 %v1663_v20, %v1379_v19  ;;  %v1158_v20 = vld [vmem:[%s2385_s9 + $0x38] sm:$0xff] }
 0x22b   : > { %v1006_v22 = vadd.f32 %v1379_v19, %v988_v21  ;;  %v1157_v19 = vld [vmem:[%s2385_s9 + $0x30] sm:$0xff] }
 0x22c   : > { %v1906_v21 = vpack.c.bf16 %v1158_v20, %v1157_v19 }
 0x22d   : > { %1008 = vadd.xlane.f32.xlu0 %v1006_v22 }
 0x231   : > { %1010 = vadd.xlane.f32.xlu0 %v1007_v23 }
 0x2ba   : > { %v1009_v30 = vpop.xlane.xlu0 %1008 }
 0x2bb   : > { %v1013_v31 = vmul.f32 0.0078125, %v1009_v30 }
 0x2bd   : > { %v1015_v32 = vsub.f32 %v1006_v22, %v1013_v31 }
 0x2be   : > { %v1011_v33 = vpop.xlane.xlu0 %1010 }
 0x2bf   : > { %v1014_v34 = vmul.f32 0.0078125, %v1011_v33  ;;  %v1017_v35 = vmul.f32 %v1015_v32, %v1015_v32 }
 0x2c1   : > { %v1016_v36 = vsub.f32 %v1007_v23, %v1014_v34  ;;  %1019 = vadd.xlane.f32.xlu1 %v1017_v35  ;;  %v1382_v23 = vld [vmem:[%s2384_s8] ss:$0 sm:$0xff] }
 0x2c3   : > { %v1018_v37 = vmul.f32 %v1016_v36, %v1016_v36 }
 0x2c5   : > { %1021 = vadd.xlane.f32.xlu1 %v1018_v37 }
 0x34e   : > { %v1020_v59 = vpop.xlane.xlu1 %1019 }
 0x34f   : > { %v1023_v60 = vmul.f32 0.0078125, %v1020_v59 }
 0x351   : > { %v1025_v61 = vadd.f32 1e-05, %v1023_v60 }
 0x352   : > { %v1022_v62 = vpop.xlane.xlu1 %1021 }
 0x353   : > { %1926 = vrsqrt.f32 %v1025_v61  ;;  %v1024_v63 = vmul.f32 0.0078125, %v1022_v62 }
 0x355   : > { %v1026_v0 = vadd.f32 1e-05, %v1024_v63 }
 0x357   : > { %1928 = vrsqrt.f32 %v1026_v0 }
 0x35d   : > { %v1927_v1 = vpop.eup %1926 }
 0x35e   : > { %v1029_v3 = vmul.f32 %v1927_v1, %v1015_v32 }
 0x360   : > { %v1038_v5 = vmul.f32 %v1380_v2, %v1029_v3 }
 0x361   : > { %v1929_v6 = vpop.eup %1928 }
 0x362   : > { %v1030_v7 = vmul.f32 %v1929_v6, %v1016_v36  ;;  %v1047_v8 = vadd.f32 %v1381_v4, %v1038_v5 }
 0x364   : > { %v1039_v13 = vmul.f32 %v1380_v2, %v1030_v7  ;;  %1696 = vmatprep.mubr.f32.mxu0 %v1047_v8 }
 0x366   : > { %v1048_v14 = vadd.f32 %v1381_v4, %v1039_v13 }
 0x368   : > { %1697 = vmatmul.mubr.f32.vlgmr.msra.gmra.mrb[2].mxu0 %v1048_v14 }
 0x369   : > { %1897 = vmatpush3.bf16.msra.mxu0 %v1894_v58  ;;  %1715 = vmatprep.mubr.msk.f32.mxu0 %vm435_vm2, %v2038_v11 }
 0x36a   : > { %1899 = vmatprep.subr.bf16.mxu0 %v1898_v15 }
 0x36d   : > { %1901 = vmatpush3.bf16.msra.mxu0 %v1898_v15 }
 0x36e   : > { %1903 = vmatprep.subr.bf16.mxu0 %v1902_v18 }
 0x371   : > { %1905 = vmatpush3.bf16.msra.mxu0 %v1902_v18 }
 0x372   : > { %1907 = vmatprep.subr.bf16.mxu0 %v1906_v21 }
 0x375   : > { %1909 = vmatpush3.bf16.msra.mxu0 %v1906_v21 }
 0x378   : > { %1716 = vmatmul.mubr.msk.f32.vlgmr.msra.gmra.mrb[4].mxu0 %vm435_vm2, %v2040_v12 }
 0x43b   : > { %v1698_v11 = vpop.f32.mrb[2].mxu0 }
 0x43c   : > { %v1138_v22 = vpop.f32.mrb[3].mxu0  ;;  %v1144_v24 = vadd.f32 %v1698_v11, %v1382_v23 }
 0x43d   : > { %v1139_v25 = vadd.f32 %v1382_v23, %v1138_v22 }
 0x43e   : > { %v1148_v26 = vadd.f32 %v1144_v24, %v1048_v14 }
 0x43f   : > { %v1147_v27 = vadd.f32 %v1139_v25, %v1047_v8 }
 0x440   : > { %v1150_v30 = vmax.f32 %v1148_v26, 0.0 }
 0x441   : > { %v1149_v33 = vmax.f32 %v1147_v27, 0.0 }
 0x44b   : > { %v1717_v29 = vpop.f32.mrb[4].mxu0 }
 0x44c   : > { %v1242_v31 = vadd.f32 %v1717_v29, %v1383_v28  ;;  %v1236_v32 = vpop.f32.mrb[5].mxu0 }
 0x44d   : > { %v1237_v12 = vadd.f32 %v1383_v28, %v1236_v32 }
 0x44e   : > { %v1246_v34 = vadd.f32 %v1242_v31, %v1150_v30 }
 0x44f   : > { %v1245_v35 = vadd.f32 %v1237_v12, %v1149_v33 }
 0x450   : > { %1248 = vst [vmem:[%s400_s21 + $0x8] sm:$0xff] %v1246_v34 }
 0x451   : > { %1247 = vst [vmem:[%s400_s21] sm:$0xff] %v1245_v35 }
 0x452 PF: > { %s21_s17 = sadd.s32 1, %s1936_s17  }
 0x453   : > { %p18_p4 = scmp.ge.s32.totalorder %s21_s17, 4  }
 0x455   :  { %20 = sbr.rel (!%p18_p4) target bundleno = 1 (0x1), region = 101 }

</bundles_post_ra>
